<compile_context>
chip_gen: v7x
topology: tpu7x:2x2x1
jax: 0.10.0
libtpu: 0.0.40
codegen_flags: <defaults>
</compile_context>

<pallas_src>
import jax
import jax.numpy as jnp
from jax.experimental import pallas as pl
from jax.experimental.pallas import tpu as pltpu

HIDDEN = 128   # feature-layer width
STREAM = 64    # value / advantage hidden width
LANES = 128    # lane-dense slab width (value in lane 0, advantages in lanes 1..A)


def _round_up(n, m):
    return ((n + m - 1) // m) * m


def d3q_forward(x, params, *, block_batch=512, compute_dtype=jnp.float32):
    """Dueling-DQN forward. x: [B, state_size] f32 -> [B, action_size] f32."""
    (w1, b1, wv1, bv1, wv2, bv2, wa1, ba1, wa2, ba2) = params
    batch, state_size = x.shape
    action_size = wa2.shape[1]
    assert action_size + 1 <= LANES

    # ---- pack weights into lane-dense fused operands (layout plumbing) -------
    # hidden streams fused: [vh | ah] = relu(feats @ Wh + bh)
    wh = jnp.concatenate([wv1, wa1], axis=1)              # [128, 128]
    bh = jnp.concatenate([bv1, ba1], axis=1)              # [1, 128]
    # output streams fused block-diagonally: lane 0 = value, lanes 1..A = adv
    wo = jnp.zeros((HIDDEN, LANES), jnp.float32)
    wo = wo.at[:STREAM, 0:1].set(wv2)
    wo = wo.at[STREAM:, 1:1 + action_size].set(wa2)
    bo = jnp.zeros((1, LANES), jnp.float32)
    bo = bo.at[:, 0:1].set(bv2)
    bo = bo.at[:, 1:1 + action_size].set(ba2)

    # MXU operand dtype (bf16 doubles MXU rate on v6e/v7x); accumulate in f32.
    x_c = x.astype(compute_dtype)
    w1_c = w1.astype(compute_dtype)
    wh_c = wh.astype(compute_dtype)
    wo_c = wo.astype(compute_dtype)

    # ---- batch tiling: tile is a multiple of 8 sublanes, pad batch to it -----
    tb = min(_round_up(block_batch, 8), _round_up(batch, 8))
    batch_pad = _round_up(batch, tb)
    n_tiles = batch_pad // tb
    if batch_pad != batch:
        x_c = jnp.pad(x_c, ((0, batch_pad - batch), (0, 0)))

    inv_n = 1.0 / float(batch * action_size)

    def _mlp_slab(x_ref, w1_ref, b1_ref, wh_ref, bh_ref, wo_ref, bo_ref):
        # fused 3-matmul MLP producing the lane-dense [tb, 128] output slab
        feats = jnp.dot(x_ref[...], w1_ref[...],
                        preferred_element_type=jnp.float32)
        feats = jnp.maximum(feats + b1_ref[...], 0.0)
        h = jnp.dot(feats.astype(wh_ref.dtype), wh_ref[...],
                    preferred_element_type=jnp.float32)
        h = jnp.maximum(h + bh_ref[...], 0.0)
        return jnp.dot(h.astype(wo_ref.dtype), wo_ref[...],
                       preferred_element_type=jnp.float32) + bo_ref[...]

    def _adv_mask(tile_row0):
        # True only for real (unpadded) batch rows and advantage lanes 1..A
        row_ids = tile_row0 + jax.lax.broadcasted_iota(jnp.int32, (tb, 1), 0)
        lane_ids = jax.lax.broadcasted_iota(jnp.int32, (1, LANES), 1)
        return (row_ids < batch) & (lane_ids >= 1) & (lane_ids <= action_size)

    def w_spec(shape):
        return pl.BlockSpec(shape, lambda i: (0, 0))   # VMEM-resident weights

    weight_specs = [
        pl.BlockSpec((tb, state_size), lambda i: (i, 0)),
        w_spec((state_size, HIDDEN)),
        w_spec((1, HIDDEN)),
        w_spec((HIDDEN, HIDDEN)),
        w_spec((1, HIDDEN)),
        w_spec((HIDDEN, LANES)),
        w_spec((1, LANES)),
    ]
    weight_args = (x_c, w1_c, b1, wh_c, bh, wo_c, bo)

    # ================= FAST PATH: whole batch fits one tile ===================
    if n_tiles == 1:
        def fused_kernel(x_ref, w1_ref, b1_ref, wh_ref, bh_ref, wo_ref, bo_ref,
                         out_ref):
            slab = _mlp_slab(x_ref, w1_ref, b1_ref, wh_ref, bh_ref,
                             wo_ref, bo_ref)
            adv_mean = jnp.sum(jnp.where(_adv_mask(0), slab, 0.0)) * inv_n
            # lane-dense dueling combine: lanes 1..A hold the q-values
            out_ref[...] = slab[:, 0:1] + slab - adv_mean

        q_slab = pl.pallas_call(
            fused_kernel,
            out_shape=jax.ShapeDtypeStruct((batch_pad, LANES), jnp.float32),
            grid=(1,),
            in_specs=weight_specs,
            out_specs=pl.BlockSpec((tb, LANES), lambda i: (i, 0)),
            compiler_params=pltpu.CompilerParams(
                dimension_semantics=("arbitrary",)),
        )(*weight_args)
        return q_slab[:batch, 1:1 + action_size]

    # ============ pass 1: fused MLP + per-tile advantage partial sums =========
    def main_kernel(x_ref, w1_ref, b1_ref, wh_ref, bh_ref, wo_ref, bo_ref,
                    slab_ref, psum_ref):
        slab = _mlp_slab(x_ref, w1_ref, b1_ref, wh_ref, bh_ref, wo_ref, bo_ref)
        slab_ref[...] = slab
        # masked partial sum of the advantage lanes only (exact global mean):
        # padded batch rows and the value/zero lanes must not leak into it.
        mask = _adv_mask(pl.program_id(0) * tb)
        psum = jnp.sum(jnp.where(mask, slab, 0.0), axis=0, keepdims=True)
        psum_ref[...] = psum[None]          # [1, 1, LANES]

    slab, psums = pl.pallas_call(
        main_kernel,
        out_shape=(jax.ShapeDtypeStruct((batch_pad, LANES), jnp.float32),
                   jax.ShapeDtypeStruct((n_tiles, 1, LANES), jnp.float32)),
        grid=(n_tiles,),
        in_specs=weight_specs,
        out_specs=(
            pl.BlockSpec((tb, LANES), lambda i: (i, 0)),
            pl.BlockSpec((1, 1, LANES), lambda i: (i, 0, 0)),
        ),
        compiler_params=pltpu.CompilerParams(
            dimension_semantics=("parallel",)),
    )(*weight_args)

    # ============ pass 2: dueling combine with exact global mean ==============
    def combine_kernel(psum_ref, slab_ref, out_ref):
        adv_mean = jnp.sum(psum_ref[...]) * inv_n
        slab_t = slab_ref[...]
        # lane-dense combine: lanes 1..A hold the q-values, the rest discarded
        out_ref[...] = slab_t[:, 0:1] + slab_t - adv_mean

    q_slab = pl.pallas_call(
        combine_kernel,
        out_shape=jax.ShapeDtypeStruct((batch_pad, LANES), jnp.float32),
        grid=(n_tiles,),
        in_specs=[
            pl.BlockSpec((n_tiles, 1, LANES), lambda i: (0, 0, 0)),
            pl.BlockSpec((tb, LANES), lambda i: (i, 0)),
        ],
        out_specs=pl.BlockSpec((tb, LANES), lambda i: (i, 0)),
        compiler_params=pltpu.CompilerParams(
            dimension_semantics=("parallel",)),
    )(psums, slab)

    return q_slab[:batch, 1:1 + action_size]


def init_params(key, state_size, action_size):
    """Deterministic synthetic initialization (shapes match nn.Linear layers)."""
    ks = jax.random.split(key, 10)

    def lin(kw, kb, fan_in, fan_out):
        bound = 1.0 / jnp.sqrt(fan_in)
        w = jax.random.uniform(kw, (fan_in, fan_out), jnp.float32, -bound, bound)
        b = jax.random.uniform(kb, (1, fan_out), jnp.float32, -bound, bound)
        return w, b

    w1, b1 = lin(ks[0], ks[1], state_size, 128)
    wv1, bv1 = lin(ks[2], ks[3], 128, 64)
    wv2, bv2 = lin(ks[4], ks[5], 64, 1)
    wa1, ba1 = lin(ks[6], ks[7], 128, 64)
    wa2, ba2 = lin(ks[8], ks[9], 64, action_size)
    return (w1, b1, wv1, bv1, wv2, bv2, wa1, ba1, wa2, ba2)


def d3q_reference(x, params):
    """Pure-JAX reference for correctness check."""
    (w1, b1, wv1, bv1, wv2, bv2, wa1, ba1, wa2, ba2) = params
    feats = jnp.maximum(x @ w1 + b1, 0.0)
    values = jnp.maximum(feats @ wv1 + bv1, 0.0) @ wv2 + bv2
    adv = jnp.maximum(feats @ wa1 + ba1, 0.0) @ wa2 + ba2
    return values + (adv - jnp.mean(adv))


if __name__ == "__main__":
    state_size = 8
    action_size = 4

    key = jax.random.PRNGKey(0)
    k_x, k_p, k_x2 = jax.random.split(key, 3)
    params = init_params(k_p, state_size, action_size)

    # small example (single tile -> fully fused single-kernel path)
    batch = 2
    x = jax.random.normal(k_x, (batch, state_size), dtype=jnp.float32)
    out = jax.block_until_ready(d3q_forward(x, params))
    ref = d3q_reference(x, params)
    assert out.shape == (batch, action_size)
    assert jnp.allclose(out, ref, atol=1e-4, rtol=1e-4)

    # multi-tile check (exercises batch tiling + exact global advantages.mean())
    batch2 = 40
    x2 = jax.random.normal(k_x2, (batch2, state_size), dtype=jnp.float32)
    out2 = jax.block_until_ready(d3q_forward(x2, params, block_batch=16))
    ref2 = d3q_reference(x2, params)
    assert out2.shape == (batch2, action_size)
    assert jnp.allclose(out2, ref2, atol=1e-4, rtol=1e-4)

    print("KERNEL_OK")
</pallas_src>

<mosaic_0001>
module attributes {stable_mosaic.version = 11 : i64} {
  func.func @fused_kernel(%arg0: i32, %arg1: memref<8x8xf32, #tpu.memory_space<vmem>>, %arg2: memref<8x128xf32, #tpu.memory_space<vmem>>, %arg3: memref<1x128xf32, #tpu.memory_space<vmem>>, %arg4: memref<128x128xf32, #tpu.memory_space<vmem>>, %arg5: memref<1x128xf32, #tpu.memory_space<vmem>>, %arg6: memref<128x128xf32, #tpu.memory_space<vmem>>, %arg7: memref<1x128xf32, #tpu.memory_space<vmem>>, %arg8: memref<8x128xf32, #tpu.memory_space<vmem>>) attributes {dimension_semantics = [#tpu.dimension_semantics<arbitrary>], iteration_bounds = array<i64: 1>, scalar_prefetch = 0 : i64, scratch_operands = 0 : i64, tpu.core_type = #tpu.core_type<tc>, window_params = [{transform_indices = @transform_0, window_bounds = array<i64: 8, 8>}, {pipeline_mode = #tpu.pipeline_mode<synchronous>, transform_indices = @transform_1, window_bounds = array<i64: 8, 128>}, {pipeline_mode = #tpu.pipeline_mode<synchronous>, transform_indices = @transform_2, window_bounds = array<i64: 1, 128>}, {pipeline_mode = #tpu.pipeline_mode<synchronous>, transform_indices = @transform_3, window_bounds = array<i64: 128, 128>}, {pipeline_mode = #tpu.pipeline_mode<synchronous>, transform_indices = @transform_4, window_bounds = array<i64: 1, 128>}, {pipeline_mode = #tpu.pipeline_mode<synchronous>, transform_indices = @transform_5, window_bounds = array<i64: 128, 128>}, {pipeline_mode = #tpu.pipeline_mode<synchronous>, transform_indices = @transform_6, window_bounds = array<i64: 1, 128>}, {transform_indices = @transform_7, window_bounds = array<i64: 8, 128>}]} {
    %c0 = arith.constant 0 : index
    %c0_0 = arith.constant 0 : index
    %0 = vector.load %arg1[%c0, %c0_0] : memref<8x8xf32, #tpu.memory_space<vmem>>, vector<8x8xf32>
    %c0_1 = arith.constant 0 : index
    %c0_2 = arith.constant 0 : index
    %1 = vector.load %arg2[%c0_1, %c0_2] : memref<8x128xf32, #tpu.memory_space<vmem>>, vector<8x128xf32>
    %cst = arith.constant dense<0.000000e+00> : vector<8x128xf32>
    %2 = tpu.matmul %0, %1, %cst {dimension_numbers = #tpu.dot_dimension_numbers<[1], [0], [0], [1], [0, 0, 1, 1], [], []>} : vector<8x8xf32>, vector<8x128xf32>, vector<8x128xf32> -> vector<8x128xf32>
    %c0_3 = arith.constant 0 : index
    %c0_4 = arith.constant 0 : index
    %3 = vector.load %arg3[%c0_3, %c0_4] : memref<1x128xf32, #tpu.memory_space<vmem>>, vector<1x128xf32>
    %4 = vector.broadcast %3 : vector<1x128xf32> to vector<8x128xf32>
    %5 = arith.addf %2, %4 : vector<8x128xf32>
    %cst_5 = arith.constant 0.000000e+00 : f32
    %6 = vector.broadcast %cst_5 : f32 to vector<8x128xf32>
    %7 = arith.maximumf %5, %6 : vector<8x128xf32>
    %c0_6 = arith.constant 0 : index
    %c0_7 = arith.constant 0 : index
    %8 = vector.load %arg4[%c0_6, %c0_7] : memref<128x128xf32, #tpu.memory_space<vmem>>, vector<128x128xf32>
    %cst_8 = arith.constant dense<0.000000e+00> : vector<8x128xf32>
    %9 = tpu.matmul %7, %8, %cst_8 {dimension_numbers = #tpu.dot_dimension_numbers<[1], [0], [0], [1], [0, 0, 1, 1], [], []>} : vector<8x128xf32>, vector<128x128xf32>, vector<8x128xf32> -> vector<8x128xf32>
    %c0_9 = arith.constant 0 : index
    %c0_10 = arith.constant 0 : index
    %10 = vector.load %arg5[%c0_9, %c0_10] : memref<1x128xf32, #tpu.memory_space<vmem>>, vector<1x128xf32>
    %11 = vector.broadcast %10 : vector<1x128xf32> to vector<8x128xf32>
    %12 = arith.addf %9, %11 : vector<8x128xf32>
    %cst_11 = arith.constant 0.000000e+00 : f32
    %13 = vector.broadcast %cst_11 : f32 to vector<8x128xf32>
    %14 = arith.maximumf %12, %13 : vector<8x128xf32>
    %c0_12 = arith.constant 0 : index
    %c0_13 = arith.constant 0 : index
    %15 = vector.load %arg6[%c0_12, %c0_13] : memref<128x128xf32, #tpu.memory_space<vmem>>, vector<128x128xf32>
    %cst_14 = arith.constant dense<0.000000e+00> : vector<8x128xf32>
    %16 = tpu.matmul %14, %15, %cst_14 {dimension_numbers = #tpu.dot_dimension_numbers<[1], [0], [0], [1], [0, 0, 1, 1], [], []>} : vector<8x128xf32>, vector<128x128xf32>, vector<8x128xf32> -> vector<8x128xf32>
    %c0_15 = arith.constant 0 : index
    %c0_16 = arith.constant 0 : index
    %17 = vector.load %arg7[%c0_15, %c0_16] : memref<1x128xf32, #tpu.memory_space<vmem>>, vector<1x128xf32>
    %18 = vector.broadcast %17 : vector<1x128xf32> to vector<8x128xf32>
    %19 = arith.addf %16, %18 : vector<8x128xf32>
    %20 = tpu.iota {dimensions = array<i32: 0>} : vector<8x1xi32>
    %c0_i32 = arith.constant 0 : i32
    %21 = vector.broadcast %c0_i32 : i32 to vector<8x1xi32>
    %22 = arith.addi %21, %20 : vector<8x1xi32>
    %23 = tpu.iota {dimensions = array<i32: 1>} : vector<1x128xi32>
    %c2_i32 = arith.constant 2 : i32
    %24 = vector.broadcast %c2_i32 : i32 to vector<8x1xi32>
    %25 = arith.cmpi slt, %22, %24 : vector<8x1xi32>
    %c1_i32 = arith.constant 1 : i32
    %26 = vector.broadcast %c1_i32 : i32 to vector<1x128xi32>
    %27 = arith.cmpi sge, %23, %26 : vector<1x128xi32>
    %28 = vector.broadcast %25 : vector<8x1xi1> to vector<8x128xi1>
    %29 = vector.broadcast %27 : vector<1x128xi1> to vector<8x128xi1>
    %30 = arith.andi %28, %29 : vector<8x128xi1>
    %c4_i32 = arith.constant 4 : i32
    %31 = vector.broadcast %c4_i32 : i32 to vector<1x128xi32>
    %32 = arith.cmpi sle, %23, %31 : vector<1x128xi32>
    %33 = vector.broadcast %32 : vector<1x128xi1> to vector<8x128xi1>
    %34 = arith.andi %30, %33 : vector<8x128xi1>
    %cst_17 = arith.constant 0.000000e+00 : f32
    %35 = vector.broadcast %cst_17 : f32 to vector<8x128xf32>
    %36 = arith.select %34, %19, %35 : vector<8x128xi1>, vector<8x128xf32>
    %37 = vector.shape_cast %36 : vector<8x128xf32> to vector<1x8x128xf32>
    %cst_18 = arith.constant dense<0.000000e+00> : vector<1xf32>
    %38 = vector.multi_reduction <add>, %37, %cst_18 [1, 2] : vector<1x8x128xf32> to vector<1xf32>
    %39 = vector.shape_cast %38 : vector<1xf32> to vector<1x1x1xf32>
    %40 = vector.extract %39[0, 0, 0] : f32 from vector<1x1x1xf32>
    %cst_19 = arith.constant 1.250000e-01 : f32
    %41 = arith.mulf %40, %cst_19 : f32
    %42 = vector.extract_strided_slice %19 {offsets = [0, 0], sizes = [8, 1], strides = [1, 1]} : vector<8x128xf32> to vector<8x1xf32>
    %43 = vector.broadcast %42 : vector<8x1xf32> to vector<8x128xf32>
    %44 = arith.addf %43, %19 : vector<8x128xf32>
    %45 = vector.broadcast %41 : f32 to vector<8x128xf32>
    %46 = arith.subf %44, %45 : vector<8x128xf32>
    %c0_20 = arith.constant 0 : index
    %c0_21 = arith.constant 0 : index
    %47 = vector.load %arg8[%c0_20, %c0_21] : memref<8x128xf32, #tpu.memory_space<vmem>>, vector<8x128xf32>
    tpu.vector_store %arg8[%c0_20, %c0_21], %46 {strides = array<i32>} : memref<8x128xf32, #tpu.memory_space<vmem>>, vector<8x128xf32>,
    return
  }
  func.func @transform_0(%arg0: i32) -> (i32, i32) {
    %c0_i32 = arith.constant 0 : i32
    %c0_i32_0 = arith.constant 0 : i32
    return %arg0, %c0_i32 : i32, i32
  }
  func.func @transform_1(%arg0: i32) -> (i32, i32) {
    %c0_i32 = arith.constant 0 : i32
    %c0_i32_0 = arith.constant 0 : i32
    %c0_i32_1 = arith.constant 0 : i32
    return %c0_i32, %c0_i32_0 : i32, i32
  }
  func.func @transform_2(%arg0: i32) -> (i32, i32) {
    %c0_i32 = arith.constant 0 : i32
    %c0_i32_0 = arith.constant 0 : i32
    %c0_i32_1 = arith.constant 0 : i32
    return %c0_i32, %c0_i32_0 : i32, i32
  }
  func.func @transform_3(%arg0: i32) -> (i32, i32) {
    %c0_i32 = arith.constant 0 : i32
    %c0_i32_0 = arith.constant 0 : i32
    %c0_i32_1 = arith.constant 0 : i32
    return %c0_i32, %c0_i32_0 : i32, i32
  }
  func.func @transform_4(%arg0: i32) -> (i32, i32) {
    %c0_i32 = arith.constant 0 : i32
    %c0_i32_0 = arith.constant 0 : i32
    %c0_i32_1 = arith.constant 0 : i32
    return %c0_i32, %c0_i32_0 : i32, i32
  }
  func.func @transform_5(%arg0: i32) -> (i32, i32) {
    %c0_i32 = arith.constant 0 : i32
    %c0_i32_0 = arith.constant 0 : i32
    %c0_i32_1 = arith.constant 0 : i32
    return %c0_i32, %c0_i32_0 : i32, i32
  }
  func.func @transform_6(%arg0: i32) -> (i32, i32) {
    %c0_i32 = arith.constant 0 : i32
    %c0_i32_0 = arith.constant 0 : i32
    %c0_i32_1 = arith.constant 0 : i32
    return %c0_i32, %c0_i32_0 : i32, i32
  }
  func.func @transform_7(%arg0: i32) -> (i32, i32) {
    %c0_i32 = arith.constant 0 : i32
    %c0_i32_0 = arith.constant 0 : i32
    return %arg0, %c0_i32 : i32, i32
  }
}

</mosaic_0001>

<bundles_post_ra>
// kernel: tpu_custom_call.1
= control target key start
LH: loop header
LB: loop body
LE: loop exit
PB: predicated region body
PF: predicated region fallthrough
CT: control target
= control target key end

     0   :  { %12 = vsyncpa [#allocation3], 0  ;;  %s835_s0 = inlined_call_operand.hbm [shape: f32[8,8], index: 0, kind: input, shape index: {}]   ;;  %s836_s1 = inlined_call_operand.hbm [shape: f32[8,128], index: 1, kind: input, shape index: {}]   ;;  %s837_s2 = inlined_call_operand.vmem [shape: f32[1,128], index: 2, kind: input, shape index: {}]   ;;  %s838_s3 = inlined_call_operand.hbm [shape: f32[128,128], index: 3, kind: input, shape index: {}]   ;;  %s839_s4 = inlined_call_operand.vmem [shape: f32[1,128], index: 4, kind: input, shape index: {}]   ;;  %s840_s5 = inlined_call_operand.hbm [shape: f32[128,128], index: 5, kind: input, shape index: {}]   ;;  %s841_s6 = inlined_call_operand.vmem [shape: f32[1,128], index: 6, kind: input, shape index: {}]   ;;  %s842_s7 = inlined_call_operand.hbm [shape: f32[8,128], index: 7, kind: output, shape index: {}]  }
   0x1   :  { %13 = vsyncpa [#allocation6], 0 }
   0x2   :  { %14 = vsyncpa [#allocation9], 0 }
   0x3   :  { %15 = vsyncpa [#allocation4], 0  ;;  %s696_s24 = smov [#allocation5]   ;;  %s697_s26 = smov [#allocation2]  }
   0x4   :  { %s32_s25 = sshll.u32 %s696_s24, 4  ;;  %s22_s27 = sshll.u32 %s697_s26, 4  ;;  %s33_s25 = int_to_ptr.vmem [resolvable:$true] %s32_s25  ;;  %s23_s27 = int_to_ptr.vmem [resolvable:$true] %s22_s27 }
   0x5   :  { %s578_s30 = scalar_lea.hbm %s836_s1, 128 }
   0x6   :  { %p579_p0 = scmp.ne.s32.totalorder %s836_s1, %s578_s30  ;;  %p582_p1 = scmp.lt.u32.totalorder %s578_s30, %s836_s1 }
   0x8   :  { %p584_p2 = pnand %p582_p1, %p579_p0 }
   0xa   :  { %587 = shalt.err (!%p584_p2)
}
   0xb   :  { %s588_s12 = scalar_lea.vmem %s33_s25, 128  ;;  %p593_p4 = scmp.lt.s32.totalorder %s33_s25, %s33_s25 }
   0xc   :  { %p589_p3 = scmp.ne.s32.totalorder %s33_s25, %s588_s12  ;;  %p594_p5 = scmp.lt.s32.totalorder %s588_s12, %s588_s12 }
   0xe   :  { %p595_p6 = por %p594_p5, %p593_p4 }
  0x10   :  { %p596_p7 = pnand %p595_p6, %p589_p3 }
  0x12   :  { %599 = shalt.err (!%p596_p7)
}
  0x13   :  { %35 = dma.hbm_to_vmem [thread:$0]  %s836_s1, 128, %s33_s25, [#allocation6]  }
  0x14   :  { %s600_s17 = scalar_lea.hbm %s835_s0, 128 }
  0x15   :  { %p601_p8 = scmp.ne.s32.totalorder %s835_s0, %s600_s17  ;;  %p604_p9 = scmp.lt.u32.totalorder %s600_s17, %s835_s0 }
  0x17   :  { %p606_p10 = pnand %p604_p9, %p601_p8 }
  0x19   :  { %609 = shalt.err (!%p606_p10)
}
  0x1a   :  { %s610_s22 = scalar_lea.vmem %s23_s27, 128  ;;  %p615_p12 = scmp.lt.s32.totalorder %s23_s27, %s23_s27 }
  0x1b   :  { %p611_p11 = scmp.ne.s32.totalorder %s23_s27, %s610_s22  ;;  %p616_p13 = scmp.lt.s32.totalorder %s610_s22, %s610_s22 }
  0x1d   :  { %p617_p0 = por %p616_p13, %p615_p12 }
  0x1f   :  { %p618_p1 = pnand %p617_p0, %p611_p11 }
  0x21   :  { %621 = shalt.err (!%p618_p1)
}
  0x22   :  { %25 = dma.hbm_to_vmem [thread:$0]  %s835_s0, 128, %s23_s27, [#allocation3]  }
  0x23   :  { %s698_s24 = smov [#allocation7]   ;;  %s622_s29 = scalar_lea.hbm %s838_s3, 2048 }
  0x24   :  { %s43_s25 = sshll.u32 %s698_s24, 4  ;;  %p623_p2 = scmp.ne.s32.totalorder %s838_s3, %s622_s29  ;;  %s44_s25 = int_to_ptr.vmem [resolvable:$true] %s43_s25 }
  0x25   :  { %p626_p3 = scmp.lt.u32.totalorder %s622_s29, %s838_s3 }
  0x27   :  { %p628_p4 = pnand %p626_p3, %p623_p2 }
  0x29   :  { %631 = shalt.err (!%p628_p4)
}
  0x2a   :  { %s632_s11 = scalar_lea.vmem %s44_s25, 2048  ;;  %p637_p6 = scmp.lt.s32.totalorder %s44_s25, %s44_s25 }
  0x2b   :  { %p633_p5 = scmp.ne.s32.totalorder %s44_s25, %s632_s11  ;;  %p638_p7 = scmp.lt.s32.totalorder %s632_s11, %s632_s11 }
  0x2d   :  { %p639_p8 = por %p638_p7, %p637_p6 }
  0x2f   :  { %p640_p9 = pnand %p639_p8, %p633_p5 }
  0x31   :  { %643 = shalt.err (!%p640_p9)
}
  0x32   :  { %s699_s0 = smov 128   ;;  %s700_s27 = smov 8  }
  0x33   :  { %49 = dma.hbm_to_vmem [thread:$0]  %s838_s3, 2048, %s44_s25, [#allocation6], %s699_s0, %s699_s0, %s700_s27  }
  0x34   :  { %s701_s14 = smov [#allocation8]   ;;  %s644_s18 = scalar_lea.hbm %s840_s5, 2048 }
  0x35   :  { %s57_s15 = sshll.u32 %s701_s14, 4  ;;  %p645_p10 = scmp.ne.s32.totalorder %s840_s5, %s644_s18  ;;  %s58_s15 = int_to_ptr.vmem [resolvable:$true] %s57_s15 }
  0x36   :  { %p648_p11 = scmp.lt.u32.totalorder %s644_s18, %s840_s5 }
  0x38   :  { %p650_p12 = pnand %p648_p11, %p645_p10 }
  0x3a   :  { %653 = shalt.err (!%p650_p12)
}
  0x3b   :  { %s654_s1 = scalar_lea.vmem %s58_s15, 2048  ;;  %p659_p0 = scmp.lt.s32.totalorder %s58_s15, %s58_s15 }
  0x3c   :  { %p655_p13 = scmp.ne.s32.totalorder %s58_s15, %s654_s1  ;;  %p660_p1 = scmp.lt.s32.totalorder %s654_s1, %s654_s1 }
  0x3e   :  { %p661_p2 = por %p660_p1, %p659_p0 }
  0x40   :  { %p662_p3 = pnand %p661_p2, %p655_p13 }
  0x42   :  { %665 = shalt.err (!%p662_p3)
}
  0x43   :  { %63 = dma.hbm_to_vmem [thread:$0]  %s840_s5, 2048, %s58_s15, [#allocation9], %s699_s0, %s699_s0, %s700_s27  }
  0x44   :  { %688 = dma.done.wait [#allocation3], 128  }
  0x45   :  { %689 = vsyncadd [#allocation3], 4294967168 }
  0x46   :  { %690 = dma.done.wait [#allocation6], 2176  }
  0x47   :  { %691 = vsyncadd [#allocation6], 4294965120 }
  0x48   :  { %692 = dma.done.wait [#allocation9], 2048  }
  0x49   :  { %693 = vsyncadd [#allocation9], 4294965248  ;;  %v702_v0 = vmov 0.0   ;;  %vm703_vm0 = vmmov 0   ;;  %v704_v1 = vmov 0.0|0.0   ;;  %vm87_vm1 = vcmask 64512  }
  0x4a   :  { %441 = vmatprep.subr.mxu0 %v702_v0  ;;  %443 = vmatprep.mubr.msk.f32.mxu0 %vm703_vm0, %v702_v0  ;;  %v79_v2 = vld [vmem:[#allocation5] sm:$0xff]  ;;  %v78_v3 = vld [vmem:[#allocation2] sm:$0xff]  ;;  %v162_v4 = vld [vmem:[#allocation7] sm:$0xff]  ;;  %v705_v62 = vmov 0   ;;  %v349_v63 = vlaneseq  ;;  %s706_s30 = smov [#allocation10]  }
  0x4b   :  { %516 = vmatprep.subr.bf16.mxu1 %v704_v1  ;;  %478 = vmatprep.mubr.msk.f32.mxu1 %vm703_vm0, %v702_v0  ;;  %v163_v5 = vld [vmem:[#allocation7 + $0x8] sm:$0xff]  ;;  %v164_v6 = vld [vmem:[#allocation7 + $0x10] sm:$0xff]  ;;  %v165_v7 = vld [vmem:[#allocation7 + $0x18] sm:$0xff] }
  0x4c   :  { %442 = vmatpush3.msra.mxu0 %v79_v2  ;;  %v517_v8 = vpack.c.bf16 %v163_v5, %v162_v4  ;;  %v520_v9 = vpack.c.bf16 %v165_v7, %v164_v6  ;;  %v166_v10 = vld [vmem:[#allocation7 + $0x20] sm:$0xff]  ;;  %v167_v11 = vld [vmem:[#allocation7 + $0x28] sm:$0xff]  ;;  %v168_v13 = vld [vmem:[#allocation7 + $0x30] sm:$0xff]  ;;  %577 = vset.pattern.permute.xlu0 %v705_v62 }
  0x4d   :  { %444 = vmatmul.mubr.msk.f32.vlgmr.msra.gmra.mrb[0].mxu0 %vm87_vm1, %v78_v3  ;;  %540 = vmatprep.subr.bf16.mxu0 %v704_v1  ;;  %v523_v12 = vpack.c.bf16 %v167_v11, %v166_v10  ;;  %v169_v14 = vld [vmem:[#allocation7 + $0x38] sm:$0xff]  ;;  %v170_v16 = vld [vmem:[#allocation7 + $0x40] sm:$0xff]  ;;  %v171_v17 = vld [vmem:[#allocation7 + $0x48] sm:$0xff] }
  0x4e   :  { %513 = vmatprep.mubr.msk.f32.mxu0 %vm703_vm0, %v702_v0  ;;  %518 = vmatpush3.bf16.msra.mxu1 %v517_v8  ;;  %v526_v15 = vpack.c.bf16 %v169_v14, %v168_v13  ;;  %v529_v18 = vpack.c.bf16 %v171_v17, %v170_v16  ;;  %v172_v19 = vld [vmem:[#allocation7 + $0x50] sm:$0xff]  ;;  %v173_v20 = vld [vmem:[#allocation7 + $0x58] sm:$0xff]  ;;  %v174_v22 = vld [vmem:[#allocation7 + $0x60] sm:$0xff]  ;;  %v350_v0 = vshrl.u32 %v349_v63, 7 }
  0x4f   :  { %519 = vmatprep.subr.bf16.mxu1 %v704_v1  ;;  %v532_v21 = vpack.c.bf16 %v173_v20, %v172_v19  ;;  %v175_v23 = vld [vmem:[#allocation7 + $0x68] sm:$0xff]  ;;  %v176_v25 = vld [vmem:[#allocation7 + $0x70] sm:$0xff]  ;;  %v177_v26 = vld [vmem:[#allocation7 + $0x78] sm:$0xff] }
  0x50   :  { %v535_v24 = vpack.c.bf16 %v175_v23, %v174_v22  ;;  %v538_v27 = vpack.c.bf16 %v177_v26, %v176_v25  ;;  %v256_v28 = vld [vmem:[#allocation8] sm:$0xff]  ;;  %v257_v29 = vld [vmem:[#allocation8 + $0x8] sm:$0xff]  ;;  %v258_v30 = vld [vmem:[#allocation8 + $0x10] sm:$0xff]  ;;  %vm353_vm2 = vcmp.lt.s32.totalorder %v350_v0, 2 }
  0x51   :  { %v541_v31 = vpack.c.bf16 %v257_v29, %v256_v28  ;;  %v259_v32 = vld [vmem:[#allocation8 + $0x18] sm:$0xff]  ;;  %v260_v34 = vld [vmem:[#allocation8 + $0x20] sm:$0xff]  ;;  %v261_v35 = vld [vmem:[#allocation8 + $0x28] sm:$0xff] }
  0x52   :  { %521 = vmatpush3.bf16.msra.mxu1 %v520_v9  ;;  %v544_v33 = vpack.c.bf16 %v259_v32, %v258_v30  ;;  %v547_v36 = vpack.c.bf16 %v261_v35, %v260_v34  ;;  %v262_v37 = vld [vmem:[#allocation8 + $0x30] sm:$0xff]  ;;  %v263_v38 = vld [vmem:[#allocation8 + $0x38] sm:$0xff]  ;;  %v264_v40 = vld [vmem:[#allocation8 + $0x40] sm:$0xff] }
  0x53   :  { %522 = vmatprep.subr.bf16.mxu1 %v704_v1  ;;  %542 = vmatpush3.bf16.msra.mxu0 %v541_v31  ;;  %v550_v39 = vpack.c.bf16 %v263_v38, %v262_v37  ;;  %v265_v41 = vld [vmem:[#allocation8 + $0x48] sm:$0xff]  ;;  %v266_v43 = vld [vmem:[#allocation8 + $0x50] sm:$0xff]  ;;  %v267_v44 = vld [vmem:[#allocation8 + $0x58] sm:$0xff] }
  0x54   :  { %543 = vmatprep.subr.bf16.mxu0 %v704_v1  ;;  %v553_v42 = vpack.c.bf16 %v265_v41, %v264_v40  ;;  %v556_v45 = vpack.c.bf16 %v267_v44, %v266_v43  ;;  %v268_v46 = vld [vmem:[#allocation8 + $0x60] sm:$0xff]  ;;  %v269_v47 = vld [vmem:[#allocation8 + $0x68] sm:$0xff]  ;;  %v401_v49 = vld [vmem:[%s837_s2] ss:$0 sm:$0xff] }
  0x55   :  { %v559_v48 = vpack.c.bf16 %v269_v47, %v268_v46  ;;  %v270_v54 = vld [vmem:[#allocation8 + $0x70] sm:$0xff]  ;;  %v271_v55 = vld [vmem:[#allocation8 + $0x78] sm:$0xff] }
  0x56   :  { %524 = vmatpush3.bf16.msra.mxu1 %v523_v12  ;;  %v562_v56 = vpack.c.bf16 %v271_v55, %v270_v54  ;;  %v403_v57 = vld [vmem:[%s839_s4] ss:$0 sm:$0xff] }
  0x57   :  { %525 = vmatprep.subr.bf16.mxu1 %v704_v1  ;;  %545 = vmatpush3.bf16.msra.mxu0 %v544_v33  ;;  %v404_v2 = vld [vmem:[%s841_s6] ss:$0 sm:$0xff]  ;;  %s390_s6 = sshll.u32 %s706_s30, 4  ;;  %s391_s6 = int_to_ptr.vmem [resolvable:$true] %s390_s6 }
  0x58   :  { %546 = vmatprep.subr.bf16.mxu0 %v704_v1  ;;  %s666_s8 = scalar_lea.vmem %s391_s6, 128  ;;  %p671_p5 = scmp.lt.s32.totalorder %s391_s6, %s391_s6 }
  0x59   :  { %p667_p4 = scmp.ne.s32.totalorder %s391_s6, %s666_s8  ;;  %p672_p6 = scmp.lt.s32.totalorder %s666_s8, %s666_s8 }
  0x5a   :  { %527 = vmatpush3.bf16.msra.mxu1 %v526_v15 }
  0x5b   :  { %528 = vmatprep.subr.bf16.mxu1 %v704_v1  ;;  %548 = vmatpush3.bf16.msra.mxu0 %v547_v36  ;;  %p673_p7 = por %p672_p6, %p671_p5 }
  0x5c   :  { %549 = vmatprep.subr.bf16.mxu0 %v704_v1 }
  0x5d   :  { %p674_p8 = pnand %p673_p7, %p667_p4 }
  0x5e   :  { %530 = vmatpush3.bf16.msra.mxu1 %v529_v18 }
  0x5f   :  { %531 = vmatprep.subr.bf16.mxu1 %v704_v1  ;;  %551 = vmatpush3.bf16.msra.mxu0 %v550_v39 }
  0x60   :  { %552 = vmatprep.subr.bf16.mxu0 %v704_v1 }
  0x62   :  { %533 = vmatpush3.bf16.msra.mxu1 %v532_v21 }
  0x63   :  { %534 = vmatprep.subr.bf16.mxu1 %v704_v1  ;;  %554 = vmatpush3.bf16.msra.mxu0 %v553_v42 }
  0x64   :  { %555 = vmatprep.subr.bf16.mxu0 %v704_v1 }
  0x66   :  { %536 = vmatpush3.bf16.msra.mxu1 %v535_v24 }
  0x67   :  { %537 = vmatprep.subr.bf16.mxu1 %v704_v1  ;;  %557 = vmatpush3.bf16.msra.mxu0 %v556_v45 }
  0x68   :  { %558 = vmatprep.subr.bf16.mxu0 %v704_v1 }
  0x6a   :  { %539 = vmatpush3.bf16.msra.mxu1 %v538_v27 }
  0x6b   :  { %560 = vmatpush3.bf16.msra.mxu0 %v559_v48 }
  0x6c   :  { %561 = vmatprep.subr.bf16.mxu0 %v704_v1  ;;  %v352_v1 = vand.u32 127, %v349_v63 }
  0x6e   :  { %vm354_vm3 = vcmp.ge.s32.totalorder %v352_v1, 1  ;;  %vm360_vm5 = vcmp.le.s32.totalorder %v352_v1, 4 }
  0x6f   :  { %563 = vmatpush3.bf16.msra.mxu0 %v562_v56  ;;  %vm359_vm4 = vmand %vm353_vm2, %vm354_vm3 }
  0x70   :  { %vm363_vm6 = vmand %vm359_vm4, %vm360_vm5 }
 0x120   :  { %v157_v50 = vpop.f32.mrb[0].mxu0 }
 0x121   :  { %v158_v51 = vadd.f32 %v401_v49, %v157_v50  ;;  %v445_v52 = vpop.f32.mrb[1].mxu0 }
 0x123   :  { %v161_v53 = vmax.f32 %v158_v51, 0.0 }
 0x125   :  { %479 = vmatmul.mubr.f32.vlgmr.msra.gmra.mrb[0].mxu1 %v161_v53 }
 0x1f8   :  { %v251_v58 = vpop.f32.mrb[0].mxu1 }
 0x1f9   :  { %v252_v59 = vadd.f32 %v403_v57, %v251_v58  ;;  %v480_v60 = vpop.f32.mrb[1].mxu1 }
 0x1fb   :  { %v255_v61 = vmax.f32 %v252_v59, 0.0 }
 0x1fd   :  { %514 = vmatmul.mubr.f32.vlgmr.msra.gmra.mrb[2].mxu0 %v255_v61 }
 0x2d0   :  { %v345_v3 = vpop.f32.mrb[2].mxu0 }
 0x2d1   :  { %v346_v4 = vadd.f32 %v404_v2, %v345_v3  ;;  %v515_v5 = vpop.f32.mrb[3].mxu0 }
 0x2d3   :  { %v364_v6 = vsel %vm363_vm6, %v346_v4, 0.0 }
 0x2d4   :  { %365 = vadd.xlane.f32.xlu0 %v364_v6 }
 0x2ea   :  { %377 = vperm.xlu0 %577, %v346_v4  }
 0x361   :  { %v366_v7 = vpop.xlane.xlu0 %365 }
 0x362   :  { %v367_v8 = vrot.slane %v366_v7, 4 }
 0x364   :  { %v368_v9 = vadd.f32 %v367_v8, %v366_v7 }
 0x366   :  { %v369_v10 = vrot.slane %v368_v9, 2 }
 0x368   :  { %v370_v11 = vadd.f32 %v369_v10, %v368_v9 }
 0x369   :  { %v378_v14 = vpop.permute.xlu0 %377 }
 0x36a   :  { %v371_v12 = vrot.slane %v370_v11, 1  ;;  %v380_v15 = vadd.f32 %v378_v14, %v346_v4 }
 0x36c   :  { %v372_v13 = vadd.f32 %v371_v12, %v370_v11 }
 0x36e   :  { %564 = vpush %v372_v13 }
 0x39f   :  { %s565_s4 = spop %564 }
 0x3a0   :  { %s374_s29 = smul.f32 0.125, %s565_s4 }
 0x3a2   :  { %v381_v16 = vstv %s374_s29 }
 0x3a3   :  { %v382_v17 = vsub.f32 %v380_v15, %v381_v16 }
 0x3a5   :  { %383 = vst [vmem:[#allocation10] sm:$0xff] %v382_v17 }
 0x3a6   :  { %677 = shalt.err (!%p674_p8)
}
 0x3a7   :  { %s678_s11 = scalar_lea.hbm %s842_s7, 128 }
 0x3a8   :  { %p679_p9 = scmp.ne.s32.totalorder %s842_s7, %s678_s11  ;;  %p682_p10 = scmp.lt.u32.totalorder %s678_s11, %s842_s7 }
 0x3aa   :  { %p684_p11 = pnand %p682_p10, %p679_p9 }
 0x3ac   :  { %687 = shalt.err (!%p684_p11)
}
 0x3ad   :  { %393 = dma.vmem_to_hbm [thread:$0]  %s391_s6, 128, %s842_s7, [#allocation4]  }
 0x3ae   :  { %694 = dma.done.wait [#allocation4], 128  }
 0x3af   :  { %695 = vsyncadd [#allocation4], 4294967168 }
 0x3b0   :  { %397 = vsyncpa [#allocation3], 1 }
 0x3b1   :  { %398 = vsyncpa [#allocation6], 1 }
 0x3b2   :  { %399 = vsyncpa [#allocation9], 1 }
 0x3b3   :  { %400 = vsyncpa [#allocation4], 1 }

</bundles_post_ra>
